<compile_context>
chip_gen: v6e
topology: v6e:2x2x1
jax: 0.10.0
libtpu: 0.0.40
codegen_flags: <defaults>
</compile_context>

<pallas_src>
import functools

import jax
import jax.numpy as jnp
from jax.experimental import pallas as pl
from jax.experimental.pallas import tpu as pltpu

IGNORE_INDEX = -100


def _ce_kernel(logits_ref, labels_ref, tgt_ref, out_ref,
               m_sc, l_sc, *, num_v, tv, vocab, mask_vocab):
    """Online-logsumexp cross entropy over one (row_tile, vocab_tile) block."""
    k = pl.program_id(1)                      # vocab-tile index (inner, "arbitrary")

    @pl.when(k == 0)
    def _init():
        m_sc[...] = jnp.full_like(m_sc, -jnp.inf)
        l_sc[...] = jnp.zeros_like(l_sc)

    x = logits_ref[...]                       # (tm, tv), input dtype (bf16 stays bf16)

    if mask_vocab:
        # Only the last vocab tile can run past V; for earlier tiles the
        # condition is always true so the select is the only extra cost.
        col = jax.lax.broadcasted_iota(jnp.int32, x.shape, 1)
        x = jnp.where(col < (vocab - k * tv), x,
                      jnp.full_like(x, jnp.finfo(x.dtype).min))

    # Online logsumexp update (max/compare in input dtype; exp & sums in f32).
    tile_max = jnp.max(x, axis=-1, keepdims=True).astype(jnp.float32)
    m_new = jnp.maximum(m_sc[...], tile_max)                  # (tm, 1) f32
    alpha = jnp.exp(m_sc[...] - m_new)                        # (tm, 1) f32
    p = jnp.exp(x.astype(jnp.float32) - m_new)                # (tm, tv) f32
    l_sc[...] = l_sc[...] * alpha + jnp.sum(p, axis=-1, keepdims=True)
    m_sc[...] = m_new

    @pl.when(k == num_v - 1)
    def _finalize():
        lbl = labels_ref[...]                                  # (tm, 1) int32
        tgt = tgt_ref[...]                                     # (tm, 1) f32 (pre-gathered)
        valid = lbl != IGNORE_INDEX                            # (tm, 1)
        lse = m_sc[...] + jnp.log(l_sc[...])                   # (tm, 1)
        per_row = jnp.where(valid, lse - tgt, 0.0)             # (tm, 1) f32
        loss_sum = jnp.sum(per_row)
        cnt_sum = jnp.sum(valid.astype(jnp.float32))
        # Single lane-dense (8,128) partial block per row tile:
        # sublanes 0-3 hold the loss sum, sublanes 4-7 the valid-token count.
        lanes = out_ref.shape[-1]
        loss_blk = jnp.broadcast_to(loss_sum, (4, lanes))
        cnt_blk = jnp.broadcast_to(cnt_sum, (4, lanes))
        out_ref[...] = jnp.concatenate([loss_blk, cnt_blk], axis=0)[None]


def gpt_lm_loss(logits, labels, *, tm=256, tv=8192):
    """logits: (B, S, V) float, labels: (B, S) int -> scalar mean CE loss."""
    B, S, V = logits.shape
    NR = B * S

    # Shift on the labels only (tiny array): row (b, t) of the flattened
    # logits is paired with labels[b, t+1]; the last position of every
    # sequence gets ignore_index.  The logits are NOT sliced/padded/copied.
    shifted = jnp.concatenate(
        [labels[:, 1:].astype(jnp.int32),
         jnp.full((B, 1), IGNORE_INDEX, jnp.int32)], axis=1)          # (B, S)
    lab = shifted.reshape(NR, 1)

    x2d = logits.reshape(NR, V)      # merging leading dims: no data movement

    # Hoisted target-logit gather: reads NR elements from HBM (negligible vs
    # the NR*V streamed by the kernel) and removes a full-tile lane reduction
    # plus a compare/select per element per vocab step from the kernel.
    tgt = jnp.take_along_axis(
        x2d, jnp.clip(lab, 0, V - 1), axis=-1).astype(jnp.float32)    # (NR, 1)

    # Row tile: as large as practical, multiple of the sublane packing granule
    # (8 for f32, 16 for bf16).
    sub = 16 if x2d.dtype == jnp.bfloat16 else 8
    nr_pad = -(-NR // sub) * sub
    tm_eff = max(sub, (min(tm, nr_pad) // sub) * sub)
    grid_r = -(-NR // tm_eff)

    # Pad only the tiny label/target arrays; any trailing (out-of-bounds)
    # logits rows in the last row tile are masked via their IGNORE_INDEX label
    # (jnp.where does not propagate NaN/Inf from the untaken branch).
    pad_rows = grid_r * tm_eff - NR
    if pad_rows:
        lab = jnp.concatenate(
            [lab, jnp.full((pad_rows, 1), IGNORE_INDEX, jnp.int32)], axis=0)
        tgt = jnp.concatenate(
            [tgt, jnp.zeros((pad_rows, 1), jnp.float32)], axis=0)

    # Vocab tile: full vocab if it fits; otherwise prefer a 128-aligned
    # divisor of V (no OOV masking needed), else a 128-aligned tile with
    # masking on the ragged last tile.
    if V <= tv:
        tv_eff = V
        mask_vocab = False
    else:
        tv_cap = max(128, (tv // 128) * 128)
        tv_eff = 0
        for cand in range(tv_cap, 127, -128):
            if V % cand == 0:
                tv_eff = cand
                break
        if tv_eff == 0:
            tv_eff = tv_cap
        mask_vocab = (V % tv_eff) != 0
    num_v = -(-V // tv_eff)

    kernel = functools.partial(
        _ce_kernel, num_v=num_v, tv=tv_eff, vocab=V, mask_vocab=mask_vocab)

    cost = pl.CostEstimate(
        flops=4 * NR * V,
        transcendentals=NR * V,
        bytes_accessed=NR * V * x2d.dtype.itemsize + NR * 8
        + grid_r * 8 * 128 * 4,
    )

    parts = pl.pallas_call(
        kernel,
        out_shape=jax.ShapeDtypeStruct((grid_r, 8, 128), jnp.float32),
        grid_spec=pltpu.PrefetchScalarGridSpec(
            num_scalar_prefetch=0,
            grid=(grid_r, num_v),
            in_specs=[
                pl.BlockSpec((tm_eff, tv_eff), lambda i, k: (i, k)),
                pl.BlockSpec((tm_eff, 1), lambda i, k: (i, 0)),
                pl.BlockSpec((tm_eff, 1), lambda i, k: (i, 0)),
            ],
            out_specs=pl.BlockSpec((1, 8, 128), lambda i, k: (i, 0, 0)),
            scratch_shapes=[
                pltpu.VMEM((tm_eff, 1), jnp.float32),     # running max
                pltpu.VMEM((tm_eff, 1), jnp.float32),     # running sum(exp)
            ],
        ),
        compiler_params=pltpu.CompilerParams(
            dimension_semantics=("parallel", "arbitrary"),
            vmem_limit_bytes=48 * 1024 * 1024,
        ),
        cost_estimate=cost,
    )(x2d, lab, tgt)

    loss_sum = jnp.sum(parts[:, 0, 0])
    cnt = jnp.sum(parts[:, 4, 0])
    # NOTE: cnt == 0 (every token ignored) yields NaN, matching PyTorch.
    return loss_sum / cnt


def _reference_loss(logits, labels):
    """Pure-JAX reference for correctness check."""
    V = logits.shape[-1]
    sl = logits[:, :-1, :].reshape(-1, V).astype(jnp.float32)
    sy = labels[:, 1:].reshape(-1)
    valid = sy != IGNORE_INDEX
    logp = jax.nn.log_softmax(sl, axis=-1)
    nll = -jnp.take_along_axis(
        logp, jnp.where(valid, sy, 0)[:, None], axis=-1)[:, 0]
    return jnp.sum(jnp.where(valid, nll, 0.0)) / jnp.sum(valid)


if __name__ == "__main__":
    key = jax.random.PRNGKey(0)
    k1, k2, k3, k4, k5, k6, k7, k8 = jax.random.split(key, 8)

    # Test 1: small GPT-LM shapes, single vocab tile.
    B, S, V = 2, 8, 32
    logits = jax.random.normal(k1, (B, S, V), dtype=jnp.float32)
    labels = jax.random.randint(k2, (B, S), 0, V, dtype=jnp.int32)
    loss = jax.block_until_ready(gpt_lm_loss(logits, labels))
    ref = jax.block_until_ready(_reference_loss(logits, labels))
    assert jnp.allclose(loss, ref, rtol=1e-5, atol=1e-5), (loss, ref)

    # Test 2: vocab-tiled online-logsumexp path (128-aligned divisor, no OOV
    # masking) + ignore_index.
    B2, S2, V2 = 2, 8, 256
    logits2 = jax.random.normal(k3, (B2, S2, V2), dtype=jnp.float32)
    labels2 = jax.random.randint(k4, (B2, S2), 0, V2, dtype=jnp.int32)
    labels2 = labels2.at[0, 3].set(IGNORE_INDEX)
    loss2 = jax.block_until_ready(gpt_lm_loss(logits2, labels2, tv=128))
    ref2 = jax.block_until_ready(_reference_loss(logits2, labels2))
    assert jnp.allclose(loss2, ref2, rtol=1e-5, atol=1e-5), (loss2, ref2)

    # Test 3: ragged vocab (OOV mask on last tile) + padded rows in the last
    # row tile (NR not a multiple of the sublane granule).
    B3, S3, V3 = 2, 7, 160
    logits3 = jax.random.normal(k5, (B3, S3, V3), dtype=jnp.float32)
    labels3 = jax.random.randint(k6, (B3, S3), 0, V3, dtype=jnp.int32)
    labels3 = labels3.at[1, 2].set(IGNORE_INDEX)
    loss3 = jax.block_until_ready(gpt_lm_loss(logits3, labels3, tv=128))
    ref3 = jax.block_until_ready(_reference_loss(logits3, labels3))
    assert jnp.allclose(loss3, ref3, rtol=1e-5, atol=1e-5), (loss3, ref3)

    # Test 4: bf16 logits (kept bf16 through the DMA; exp/sums in f32).
    B4, S4, V4 = 2, 8, 256
    logits4 = jax.random.normal(k7, (B4, S4, V4), dtype=jnp.float32
                                ).astype(jnp.bfloat16)
    labels4 = jax.random.randint(k8, (B4, S4), 0, V4, dtype=jnp.int32)
    loss4 = jax.block_until_ready(gpt_lm_loss(logits4, labels4, tv=128))
    ref4 = jax.block_until_ready(_reference_loss(logits4, labels4))
    assert jnp.allclose(loss4, ref4, rtol=2e-3, atol=2e-3), (loss4, ref4)

    print("KERNEL_OK")
</pallas_src>

<mosaic_0001>
module attributes {stable_mosaic.version = 11 : i64} {
  func.func @_ce_kernel(%arg0: i32, %arg1: i32, %arg2: memref<16x32xf32, #tpu.memory_space<vmem>>, %arg3: memref<16x1xi32, #tpu.memory_space<vmem>>, %arg4: memref<16x1xf32, #tpu.memory_space<vmem>>, %arg5: memref<1x8x128xf32, #tpu.memory_space<vmem>>, %arg6: memref<16x1xf32, #tpu.memory_space<vmem>>, %arg7: memref<16x1xf32, #tpu.memory_space<vmem>>) attributes {dimension_semantics = [#tpu.dimension_semantics<parallel>, #tpu.dimension_semantics<arbitrary>], iteration_bounds = array<i64: 1, 1>, scalar_prefetch = 0 : i64, scratch_operands = 2 : i64, tpu.core_type = #tpu.core_type<tc>, window_params = [{transform_indices = @transform_0, window_bounds = array<i64: 16, 32>}, {transform_indices = @transform_1, window_bounds = array<i64: 16, 1>}, {transform_indices = @transform_2, window_bounds = array<i64: 16, 1>}, {transform_indices = @transform_3, window_bounds = array<i64: 1, 8, 128>}]} {
    %c0_i32 = arith.constant 0 : i32
    %0 = arith.cmpi eq, %arg1, %c0_i32 : i32
    %1 = arith.extui %0 : i1 to i32
    %c0_i32_0 = arith.constant 0 : i32
    %2 = arith.cmpi ne, %1, %c0_i32_0 : i32
    scf.if %2 {
      %cst_15 = arith.constant 0xFF800000 : f32
      %24 = vector.broadcast %cst_15 : f32 to vector<16x1xf32>
      %c0_16 = arith.constant 0 : index
      %c0_17 = arith.constant 0 : index
      %25 = vector.load %arg6[%c0_16, %c0_17] : memref<16x1xf32, #tpu.memory_space<vmem>>, vector<16x1xf32>
      tpu.vector_store %arg6[%c0_16, %c0_17], %24 {strides = array<i32>} : memref<16x1xf32, #tpu.memory_space<vmem>>, vector<16x1xf32>,
      %cst_18 = arith.constant 0.000000e+00 : f32
      %26 = vector.broadcast %cst_18 : f32 to vector<16x1xf32>
      %c0_19 = arith.constant 0 : index
      %c0_20 = arith.constant 0 : index
      %27 = vector.load %arg7[%c0_19, %c0_20] : memref<16x1xf32, #tpu.memory_space<vmem>>, vector<16x1xf32>
      tpu.vector_store %arg7[%c0_19, %c0_20], %26 {strides = array<i32>} : memref<16x1xf32, #tpu.memory_space<vmem>>, vector<16x1xf32>,
    } else {
    }
    %c0 = arith.constant 0 : index
    %c0_1 = arith.constant 0 : index
    %3 = vector.load %arg2[%c0, %c0_1] : memref<16x32xf32, #tpu.memory_space<vmem>>, vector<16x32xf32>
    %cst = arith.constant dense<0xFF800000> : vector<16xf32>
    %4 = vector.multi_reduction <maximumf>, %3, %cst [1] : vector<16x32xf32> to vector<16xf32>
    %5 = vector.shape_cast %4 : vector<16xf32> to vector<16x1xf32>
    %c0_2 = arith.constant 0 : index
    %c0_3 = arith.constant 0 : index
    %6 = vector.load %arg6[%c0_2, %c0_3] : memref<16x1xf32, #tpu.memory_space<vmem>>, vector<16x1xf32>
    %7 = arith.maximumf %6, %5 : vector<16x1xf32>
    %c0_4 = arith.constant 0 : index
    %c0_5 = arith.constant 0 : index
    %8 = vector.load %arg6[%c0_4, %c0_5] : memref<16x1xf32, #tpu.memory_space<vmem>>, vector<16x1xf32>
    %9 = arith.subf %8, %7 : vector<16x1xf32>
    %10 = math.exp %9 : vector<16x1xf32>
    %11 = vector.broadcast %7 : vector<16x1xf32> to vector<16x32xf32>
    %12 = arith.subf %3, %11 : vector<16x32xf32>
    %13 = math.exp %12 : vector<16x32xf32>
    %c0_6 = arith.constant 0 : index
    %c0_7 = arith.constant 0 : index
    %14 = vector.load %arg7[%c0_6, %c0_7] : memref<16x1xf32, #tpu.memory_space<vmem>>, vector<16x1xf32>
    %15 = arith.mulf %14, %10 : vector<16x1xf32>
    %cst_8 = arith.constant dense<0.000000e+00> : vector<16xf32>
    %16 = vector.multi_reduction <add>, %13, %cst_8 [1] : vector<16x32xf32> to vector<16xf32>
    %17 = vector.shape_cast %16 : vector<16xf32> to vector<16x1xf32>
    %18 = arith.addf %15, %17 : vector<16x1xf32>
    %c0_9 = arith.constant 0 : index
    %c0_10 = arith.constant 0 : index
    %19 = vector.load %arg7[%c0_9, %c0_10] : memref<16x1xf32, #tpu.memory_space<vmem>>, vector<16x1xf32>
    tpu.vector_store %arg7[%c0_9, %c0_10], %18 {strides = array<i32>} : memref<16x1xf32, #tpu.memory_space<vmem>>, vector<16x1xf32>,
    %c0_11 = arith.constant 0 : index
    %c0_12 = arith.constant 0 : index
    %20 = vector.load %arg6[%c0_11, %c0_12] : memref<16x1xf32, #tpu.memory_space<vmem>>, vector<16x1xf32>
    tpu.vector_store %arg6[%c0_11, %c0_12], %7 {strides = array<i32>} : memref<16x1xf32, #tpu.memory_space<vmem>>, vector<16x1xf32>,
    %c0_i32_13 = arith.constant 0 : i32
    %21 = arith.cmpi eq, %arg1, %c0_i32_13 : i32
    %22 = arith.extui %21 : i1 to i32
    %c0_i32_14 = arith.constant 0 : i32
    %23 = arith.cmpi ne, %22, %c0_i32_14 : i32
    scf.if %23 {
      %c0_15 = arith.constant 0 : index
      %c0_16 = arith.constant 0 : index
      %24 = vector.load %arg3[%c0_15, %c0_16] : memref<16x1xi32, #tpu.memory_space<vmem>>, vector<16x1xi32>
      %c0_17 = arith.constant 0 : index
      %c0_18 = arith.constant 0 : index
      %25 = vector.load %arg4[%c0_17, %c0_18] : memref<16x1xf32, #tpu.memory_space<vmem>>, vector<16x1xf32>
      %c-100_i32 = arith.constant -100 : i32
      %26 = vector.broadcast %c-100_i32 : i32 to vector<16x1xi32>
      %27 = arith.cmpi ne, %24, %26 : vector<16x1xi32>
      %c0_19 = arith.constant 0 : index
      %c0_20 = arith.constant 0 : index
      %28 = vector.load %arg6[%c0_19, %c0_20] : memref<16x1xf32, #tpu.memory_space<vmem>>, vector<16x1xf32>
      %c0_21 = arith.constant 0 : index
      %c0_22 = arith.constant 0 : index
      %29 = vector.load %arg7[%c0_21, %c0_22] : memref<16x1xf32, #tpu.memory_space<vmem>>, vector<16x1xf32>
      %30 = math.log %29 : vector<16x1xf32>
      %31 = arith.addf %28, %30 : vector<16x1xf32>
      %32 = arith.subf %31, %25 : vector<16x1xf32>
      %cst_23 = arith.constant 0.000000e+00 : f32
      %33 = vector.broadcast %cst_23 : f32 to vector<16x1xf32>
      %34 = arith.select %27, %32, %33 : vector<16x1xi1>, vector<16x1xf32>
      %35 = vector.shape_cast %34 : vector<16x1xf32> to vector<1x16x1xf32>
      %cst_24 = arith.constant dense<0.000000e+00> : vector<1xf32>
      %36 = vector.multi_reduction <add>, %35, %cst_24 [1, 2] : vector<1x16x1xf32> to vector<1xf32>
      %37 = vector.shape_cast %36 : vector<1xf32> to vector<1x1x1xf32>
      %38 = vector.extract %37[0, 0, 0] : f32 from vector<1x1x1xf32>
      %39 = arith.extui %27 : vector<16x1xi1> to vector<16x1xi32>
      %40 = arith.sitofp %39 : vector<16x1xi32> to vector<16x1xf32>
      %41 = vector.shape_cast %40 : vector<16x1xf32> to vector<1x16x1xf32>
      %cst_25 = arith.constant dense<0.000000e+00> : vector<1xf32>
      %42 = vector.multi_reduction <add>, %41, %cst_25 [1, 2] : vector<1x16x1xf32> to vector<1xf32>
      %43 = vector.shape_cast %42 : vector<1xf32> to vector<1x1x1xf32>
      %44 = vector.extract %43[0, 0, 0] : f32 from vector<1x1x1xf32>
      %45 = vector.broadcast %38 : f32 to vector<4x128xf32>
      %46 = vector.broadcast %44 : f32 to vector<4x128xf32>
      %47 = tpu.concatenate %45, %46 in 0 : vector<4x128xf32>, vector<4x128xf32> -> vector<8x128xf32>
      %48 = vector.shape_cast %47 : vector<8x128xf32> to vector<1x8x128xf32>
      %c0_26 = arith.constant 0 : index
      %c0_27 = arith.constant 0 : index
      %c0_28 = arith.constant 0 : index
      %49 = vector.load %arg5[%c0_26, %c0_27, %c0_28] : memref<1x8x128xf32, #tpu.memory_space<vmem>>, vector<1x8x128xf32>
      tpu.vector_store %arg5[%c0_26, %c0_27, %c0_28], %48 {strides = array<i32>} : memref<1x8x128xf32, #tpu.memory_space<vmem>>, vector<1x8x128xf32>,
    } else {
    }
    return
  }
  func.func @transform_0(%arg0: i32, %arg1: i32) -> (i32, i32) {
    %c0_i32 = arith.constant 0 : i32
    return %arg0, %arg1 : i32, i32
  }
  func.func @transform_1(%arg0: i32, %arg1: i32) -> (i32, i32) {
    %c0_i32 = arith.constant 0 : i32
    %c0_i32_0 = arith.constant 0 : i32
    return %arg0, %c0_i32 : i32, i32
  }
  func.func @transform_2(%arg0: i32, %arg1: i32) -> (i32, i32) {
    %c0_i32 = arith.constant 0 : i32
    %c0_i32_0 = arith.constant 0 : i32
    return %arg0, %c0_i32 : i32, i32
  }
  func.func @transform_3(%arg0: i32, %arg1: i32) -> (i32, i32, i32) {
    %c0_i32 = arith.constant 0 : i32
    %c0_i32_0 = arith.constant 0 : i32
    %c0_i32_1 = arith.constant 0 : i32
    return %arg0, %c0_i32, %c0_i32_0 : i32, i32, i32
  }
}

</mosaic_0001>

<bundles_post_ra>
// kernel: tpu_custom_call.1
= control target key start
LH: loop header
LB: loop body
LE: loop exit
PB: predicated region body
PF: predicated region fallthrough
CT: control target
= control target key end

     0   :  { %vm26_vm0 = vcmask 261120   ;;  %s257_s0 = inlined_call_operand.vmem [shape: f32[16,32], index: 0, kind: input, shape index: {}]   ;;  %s258_s1 = inlined_call_operand.vmem [shape: s32[16,1], index: 1, kind: input, shape index: {}]   ;;  %s259_s2 = inlined_call_operand.vmem [shape: f32[16,1], index: 2, kind: input, shape index: {}]   ;;  %s260_s3 = inlined_call_operand.hbm [shape: f32[1,8,128], index: 3, kind: output, shape index: {}]  }
   0x1   :  { %v24_v0 = vld [vmem:[%s257_s0] sm:$0xff]  ;;  %v25_v1 = vld [vmem:[%s257_s0 + $0x8] sm:$0xff] }
   0x2   :  { %8 = vsyncpa [#allocation5], 0  ;;  %v27_v2 = vsel %vm26_vm0, %v24_v0, -inf  ;;  %v30_v3 = vsel %vm26_vm0, %v25_v1, -inf  ;;  %vm19_vm1 = vcmask 7168   ;;  %v192_v4 = vmov -inf  }
   0x3   :  { %28 = vmax.xlane.f32.xlu0 %v27_v2  ;;  %20 = vst.msk [vmem:[#allocation2] sm:$0xff] %vm19_vm1, %v192_v4  ;;  %21 = vst.msk [vmem:[#allocation2 + $0x8] sm:$0xff] %vm19_vm1, %v192_v4  ;;  %v193_v5 = vmov 0   ;;  %v194_v6 = vmov 0.0   ;;  %v81_v41 = vld [vmem:[%s259_s2] sm:$0xff]  ;;  %v80_v46 = vld [vmem:[%s258_s1 + $0x8] sm:$0xff] }
   0x4   :  { %156 = vset.pattern.permute.xlu1 %v193_v5  ;;  %157 = vset.pattern.permute.xlu0 %v193_v5  ;;  %22 = vst.msk [vmem:[#allocation3] sm:$0xff] %vm19_vm1, %v194_v6  ;;  %23 = vst.msk [vmem:[#allocation3 + $0x8] sm:$0xff] %vm19_vm1, %v194_v6  ;;  %v79_v43 = vld [vmem:[%s258_s1] sm:$0xff]  ;;  %v82_v49 = vld [vmem:[%s259_s2 + $0x8] sm:$0xff]  ;;  %vm84_vm3 = vcmp.ne.s32.totalorder %v80_v46, 4294967196  ;;  %s195_s2 = smov [#allocation4]  }
   0x5   :  { %vm83_vm2 = vcmp.ne.s32.totalorder %v79_v43, 4294967196  ;;  %v147_v55 = vsel %vm84_vm3, 1.0, %v194_v6  ;;  %s138_s23 = sshll.u32 %s195_s2, 4  ;;  %vm129_vm4 = vcmask 1043456   ;;  %s139_s23 = int_to_ptr.vmem [resolvable:$true] %s138_s23 }
   0x6   :  { %v146_v54 = vsel %vm83_vm2, 1.0, %v194_v6  ;;  %v116_v60 = vsel %vm19_vm1, %v147_v55, 0.0  ;;  %s170_s25 = scalar_lea.vmem %s139_s23, 128  ;;  %p175_p1 = scmp.lt.s32.totalorder %s139_s23, %s139_s23 }
   0x7   :  { %31 = vmax.xlane.f32.xlu0 %v30_v3  ;;  %v115_v59 = vsel %vm19_vm1, %v146_v54, 0.0  ;;  %p171_p0 = scmp.ne.s32.totalorder %s139_s23, %s170_s25  ;;  %p176_p2 = scmp.lt.s32.totalorder %s170_s25, %s170_s25 }
   0x8   :  { %v117_v62 = vadd.f32 %v116_v60, %v115_v59 }
   0x9   :  { %p177_p3 = por %p176_p2, %p175_p1 }
   0xa   :  { %v33_v7 = vld [vmem:[#allocation2] sm:$0xff]  ;;  %v34_v10 = vld [vmem:[#allocation2 + $0x8] sm:$0xff] }
   0xb   :  { %v59_v28 = vld [vmem:[#allocation3] sm:$0xff]  ;;  %v60_v32 = vld [vmem:[#allocation3 + $0x8] sm:$0xff]  ;;  %p178_p4 = pnand %p177_p3, %p171_p0 }
  0x8c   :  { %v29_v8 = vpop.xlane.xlu0 %28 }
  0x8d   :  { %v35_v9 = vmax.f32 %v33_v7, %v29_v8 }
  0x8f   :  { %v37_v11 = vsub.f32 %v33_v7, %v35_v9  ;;  %74 = vst.msk [vmem:[#allocation2] sm:$0xff] %vm19_vm1, %v35_v9  ;;  %45 = vperm.xlu1 %156, %v35_v9  }
  0x90   :  { %v32_v12 = vpop.xlane.xlu0 %31 }
  0x91   :  { %v36_v13 = vmax.f32 %v34_v10, %v32_v12  ;;  %v39_v25 = vmul.f32 1.442695, %v37_v11 }
  0x93   :  { %v38_v14 = vsub.f32 %v34_v10, %v36_v13  ;;  %75 = vst.msk [vmem:[#allocation2 + $0x8] sm:$0xff] %vm19_vm1, %v36_v13  ;;  %50 = vperm.xlu1 %156, %v36_v13  }
  0x95   :  { %v41_v26 = vmul.f32 1.442695, %v38_v14 }
  0x96   :  { %v85_v42 = vld [vmem:[#allocation2] sm:$0xff] }
  0x9a   :  { %v86_v50 = vld [vmem:[#allocation2 + $0x8] sm:$0xff] }
 0x10a   :  { %v46_v15 = vpop.permute.xlu1 %45 }
 0x10b   :  { %v53_v16 = vsub.f32 %v24_v0, %v46_v15 }
 0x10d   :  { %v55_v17 = vmul.f32 1.442695, %v53_v16 }
 0x10e   :  { %v51_v18 = vpop.permute.xlu1 %50 }
 0x10f   :  { %158 = vpow2.f32 %v55_v17  ;;  %v54_v19 = vsub.f32 %v25_v1, %v51_v18 }
 0x111   :  { %v57_v20 = vmul.f32 1.442695, %v54_v19 }
 0x113   :  { %160 = vpow2.f32 %v57_v20 }
 0x114   :  { %162 = vpow2.f32 %v39_v25 }
 0x115   :  { %164 = vpow2.f32 %v41_v26 }
 0x11c   :  { %v159_v21 = vpop.eup %158 }
 0x11d   :  { %v63_v22 = vsel %vm26_vm0, %v159_v21, 0.0 }
 0x11e   :  { %64 = vadd.xlane.f32.xlu0 %v63_v22 }
 0x120   :  { %v161_v23 = vpop.eup %160 }
 0x121   :  { %v66_v24 = vsel %vm26_vm0, %v161_v23, 0.0  ;;  %v163_v27 = vpop.eup %162 }
 0x122   :  { %67 = vadd.xlane.f32.xlu1 %v66_v24  ;;  %v61_v29 = vmul.f32 %v163_v27, %v59_v28  ;;  %v165_v30 = vpop.eup %164 }
 0x123   :  { %v62_v34 = vmul.f32 %v165_v30, %v60_v32 }
 0x1a7   :  { %v65_v31 = vpop.xlane.xlu0 %64 }
 0x1a8   :  { %v69_v33 = vadd.f32 %v65_v31, %v61_v29 }
 0x1aa   :  { %72 = vst.msk [vmem:[#allocation3] sm:$0xff] %vm19_vm1, %v69_v33 }
 0x1ab   :  { %v68_v35 = vpop.xlane.xlu1 %67 }
 0x1ac   :  { %v70_v36 = vadd.f32 %v68_v35, %v62_v34 }
 0x1ae   :  { %73 = vst.msk [vmem:[#allocation3 + $0x8] sm:$0xff] %vm19_vm1, %v70_v36 }
 0x1b1   :  { %v87_v37 = vld [vmem:[#allocation3] sm:$0xff] }
 0x1b2   :  { %166 = vlog2.f32 %v87_v37 }
 0x1b5   :  { %v88_v38 = vld [vmem:[#allocation3 + $0x8] sm:$0xff] }
 0x1b6   :  { %168 = vlog2.f32 %v88_v38 }
 0x1bf   :  { %v167_v39 = vpop.eup %166 }
 0x1c0   :  { %v90_v40 = vmul.f32 0.6931472, %v167_v39 }
 0x1c2   :  { %v93_v44 = vadd.f32 %v90_v40, %v85_v42 }
 0x1c3   :  { %v169_v45 = vpop.eup %168 }
 0x1c4   :  { %v92_v47 = vmul.f32 0.6931472, %v169_v45  ;;  %v95_v48 = vsub.f32 %v93_v44, %v81_v41 }
 0x1c6   :  { %v94_v51 = vadd.f32 %v92_v47, %v86_v50  ;;  %v97_v53 = vsel %vm83_vm2, %v95_v48, 0.0 }
 0x1c7   :  { %v99_v57 = vsel %vm19_vm1, %v97_v53, 0.0 }
 0x1c8   :  { %v96_v52 = vsub.f32 %v94_v51, %v82_v49 }
 0x1ca   :  { %v98_v56 = vsel %vm84_vm3, %v96_v52, 0.0 }
 0x1cb   :  { %v100_v58 = vsel %vm19_vm1, %v98_v56, 0.0 }
 0x1cc   :  { %v101_v61 = vadd.f32 %v100_v58, %v99_v57 }
 0x1ce   :  { %102 = vadd.xlane.f32.xlu0 %v101_v61 }
 0x1d2   :  { %118 = vadd.xlane.f32.xlu0 %v117_v62 }
 0x257   :  { %v103_v63 = vpop.xlane.xlu0 %102 }
 0x258   :  { %v104_v0 = vrot.slane %v103_v63, 4 }
 0x25a   :  { %v105_v1 = vadd.f32 %v104_v0, %v103_v63 }
 0x25b   :  { %v119_v2 = vpop.xlane.xlu0 %118 }
 0x25c   :  { %v106_v3 = vrot.slane %v105_v1, 2  ;;  %v120_v4 = vrot.slane %v119_v2, 4 }
 0x25e   :  { %v121_v5 = vadd.f32 %v120_v4, %v119_v2  ;;  %v107_v6 = vadd.f32 %v106_v3, %v105_v1 }
 0x260   :  { %v122_v7 = vrot.slane %v121_v5, 2  ;;  %v108_v8 = vrot.slane %v107_v6, 1 }
 0x262   :  { %v123_v9 = vadd.f32 %v122_v7, %v121_v5  ;;  %v109_v10 = vadd.f32 %v108_v8, %v107_v6 }
 0x264   :  { %148 = vpush %v109_v10  ;;  %v124_v11 = vrot.slane %v123_v9, 1 }
 0x266   :  { %v125_v12 = vadd.f32 %v124_v11, %v123_v9 }
 0x268   :  { %150 = vpush %v125_v12 }
 0x295   :  { %s149_s1 = spop %148 }
 0x296   :  { %v127_v13 = vstv %s149_s1 }
 0x299   :  { %s151_s24 = spop %150 }
 0x29a   :  { %v128_v14 = vstv %s151_s24 }
 0x29b   :  { %v130_v15 = vsel %vm129_vm4, %v127_v13, %v128_v14 }
 0x29c   :  { %131 = vst [vmem:[#allocation4] sm:$0xff] %v130_v15 }
 0x29d   :  { %181 = shalt.err (!%p178_p4)
}
 0x29e   :  { %141 = dma.vmem_to_hbm [thread:$0]  %s139_s23, 128, %s260_s3, [#allocation5]  }
 0x29f   :  { %190 = dma.done.wait [#allocation5], 128  }
 0x2a0   :  { %191 = vsyncadd [#allocation5], 4294967168 }
 0x2a1   :  { %145 = vsyncpa [#allocation5], 1 }

</bundles_post_ra>
